<compile_context>
chip_gen: v6e
topology: v6e:2x2x1
jax: 0.10.0
libtpu: 0.0.40
codegen_flags: <defaults>
</compile_context>

<pallas_src>
import functools
from typing import NamedTuple

import jax
import jax.numpy as jnp
from jax.experimental import pallas as pl
from jax.experimental.pallas import tpu as pltpu

_LANE = 128
_SUBLANE = 8


def _round_up(x, m):
    return ((x + m - 1) // m) * m


@functools.lru_cache(maxsize=None)
def _tpu_config():
    """Per-TensorCore VMEM bytes and TensorCore count (trace-time query)."""
    vmem_bytes = None
    try:
        vmem_bytes = int(pltpu.get_tpu_info().vmem_capacity_bytes)
    except Exception:
        pass
    kind = ""
    try:
        kind = jax.devices()[0].device_kind.lower()
    except Exception:
        pass
    # v7x: 2 TensorCores / chip, 64 MiB VMEM / TC. v5e/v6e: 1 TC, 128 MiB.
    num_tc = 2 if ("v7" in kind or
                   (vmem_bytes is not None and vmem_bytes <= 64 * 1024 * 1024)) else 1
    if vmem_bytes is None:
        vmem_bytes = 64 * 1024 * 1024  # conservative default if query fails
    return vmem_bytes, num_tc


# ----------------------------------------------------------------------------
# Kernel
# ----------------------------------------------------------------------------
def gated_tanh_kernel(x_ref, w_ref, b_ref, o_ref, *, n_half):
    """One (tm, tn) output tile: z = x @ [W1|W2] + [b1|b2]; tanh(z1)*sigmoid(z2)."""
    # Cast the activation tile to the weight's compute dtype (bf16 by default)
    # so the MXU runs at full bf16 throughput; accumulation stays f32.
    x = x_ref[...].astype(w_ref.dtype)
    z = jnp.dot(x, w_ref[...], preferred_element_type=jnp.float32) + b_ref[...]
    y = jnp.tanh(z[:, :n_half])           # EUP transcendental, f32
    g = jax.nn.sigmoid(z[:, n_half:])     # EUP transcendental, f32
    o_ref[...] = (y * g).astype(o_ref.dtype)


# ----------------------------------------------------------------------------
# Tiling heuristics
# ----------------------------------------------------------------------------
def _choose_n_tiling(K, N, w_bytes, vmem_budget):
    """Largest multiple-of-128 N tile whose fused (K, 2*tn) weight fits VMEM."""
    npad0 = _round_up(N, _LANE)
    resident_bufs = 1 if hasattr(pl, "Buffered") else 2
    limit = (vmem_budget * 3) // 5  # leave room for x/out tiles and scratch
    num_n = 1
    while True:
        tn = _round_up(-(-npad0 // num_n), _LANE)
        bufs = resident_bufs if num_n == 1 else 2
        if bufs * (K * 2 * tn + 2 * tn) * w_bytes <= limit or tn == _LANE:
            return tn, num_n
        num_n += 1


def _choose_m_tiling(M, K, tn, num_n, x_bytes, w_bytes, o_bytes,
                     single_buffer, vmem_budget, num_tc, tm_cap=1024):
    """8-aligned M tile fitting the VMEM budget; prefer tiles dividing M."""
    w_bufs = 1 if (num_n == 1 and single_buffer) else 2
    resident = w_bufs * (K * 2 * tn * w_bytes + 2 * tn * 4)      # weight + f32 bias
    # Double-buffered x and out rows + in-kernel f32 z / intermediates + x cast.
    per_row = 2 * (K * x_bytes + tn * o_bytes) + K * w_bytes + 16 * tn
    avail = max(vmem_budget - resident, per_row * _SUBLANE)
    cap = max(_SUBLANE, min(tm_cap, (avail // per_row // _SUBLANE) * _SUBLANE))

    base = max(1, -(-M // cap))
    if num_tc > 1 and M >= 2 * _SUBLANE:
        # Only split for parallelism on 2-TC parts, and keep the count even.
        base = _round_up(max(base, num_tc), num_tc)

    # Prefer a tile count whose tile size divides M exactly (pad is a no-op).
    for nt in range(base, base + 8):
        if num_tc > 1 and nt % num_tc:
            continue
        if M % nt == 0 and (M // nt) % _SUBLANE == 0 and (M // nt) <= cap:
            return M // nt, nt
    return _round_up(-(-M // base), _SUBLANE), base


def _block_spec(shape, index_map, resident_single_buffer):
    """BlockSpec; resident operands request single buffering when available."""
    if resident_single_buffer and hasattr(pl, "Buffered"):
        try:
            return pl.BlockSpec(shape, index_map, pipeline_mode=pl.Buffered(1))
        except TypeError:
            pass
    return pl.BlockSpec(shape, index_map)


# ----------------------------------------------------------------------------
# Parameter preparation (hoisted out of the per-call path)
# ----------------------------------------------------------------------------
class GatedTanhMeta(NamedTuple):
    n_out: int
    tn: int
    num_n: int


def prepare_gated_tanh_params(w1, b1, w2, b2, *, compute_dtype=jnp.bfloat16):
    """Fuse, pad and cast the two projections ONCE.

    w1, w2 : (input_dims, output_dims)  (PyTorch Linear.weight.T)
    b1, b2 : (output_dims,)
    Returns (w_fused, b_fused, meta) for gated_tanh_prepared().
    """
    K, N = w1.shape
    w_bytes = jnp.dtype(compute_dtype).itemsize
    vmem_bytes, _ = _tpu_config()
    vmem_budget = (vmem_bytes * 3) // 4
    tn, num_n = _choose_n_tiling(K, N, w_bytes, vmem_budget)
    npad = tn * num_n

    # Interleave per N-tile: columns [j*2tn : j*2tn+tn] = W1 block j,
    #                        columns [j*2tn+tn : (j+1)*2tn] = W2 block j.
    w1p = jnp.pad(w1, ((0, 0), (0, npad - N))).reshape(K, num_n, tn)
    w2p = jnp.pad(w2, ((0, 0), (0, npad - N))).reshape(K, num_n, tn)
    w_fused = jnp.concatenate([w1p, w2p], axis=2).reshape(K, 2 * npad)
    w_fused = w_fused.astype(compute_dtype)

    b1p = jnp.pad(b1, (0, npad - N)).astype(jnp.float32).reshape(num_n, tn)
    b2p = jnp.pad(b2, (0, npad - N)).astype(jnp.float32).reshape(num_n, tn)
    b_fused = jnp.concatenate([b1p, b2p], axis=1).reshape(1, 2 * npad)

    return w_fused, b_fused, GatedTanhMeta(n_out=N, tn=tn, num_n=num_n)


# ----------------------------------------------------------------------------
# Forward pass
# ----------------------------------------------------------------------------
@functools.partial(jax.jit,
                   static_argnames=("n_out", "tn", "num_n", "single_buffer"))
def _gated_tanh_call(x, w_fused, b_fused, *, n_out, tn, num_n, single_buffer):
    orig_shape = x.shape
    K = orig_shape[-1]
    x2 = x.reshape(-1, K)
    M = x2.shape[0]

    x_bytes = jnp.dtype(x.dtype).itemsize
    w_bytes = jnp.dtype(w_fused.dtype).itemsize
    o_bytes = x_bytes
    npad = tn * num_n

    vmem_bytes, num_tc = _tpu_config()
    vmem_budget = (vmem_bytes * 3) // 4

    tm, num_m = _choose_m_tiling(M, K, tn, num_n, x_bytes, w_bytes, o_bytes,
                                 single_buffer, vmem_budget, num_tc)
    m_pad = tm * num_m
    if m_pad != M:
        x2 = jnp.pad(x2, ((0, m_pad - M), (0, 0)))

    kernel = functools.partial(gated_tanh_kernel, n_half=tn)
    resident = (num_n == 1)

    w_streams = 1 if resident else num_m  # weight re-streamed per M-tile if N-tiled
    cost = pl.CostEstimate(
        flops=2 * m_pad * K * 2 * npad + 3 * m_pad * npad,
        transcendentals=2 * m_pad * npad,
        bytes_accessed=(m_pad * K * x_bytes
                        + w_streams * K * 2 * npad * w_bytes
                        + 2 * npad * 4
                        + m_pad * npad * o_bytes),
    )

    out = pl.pallas_call(
        kernel,
        out_shape=jax.ShapeDtypeStruct((m_pad, npad), x.dtype),
        grid_spec=pltpu.PrefetchScalarGridSpec(
            num_scalar_prefetch=0,
            grid=(num_m, num_n),
            in_specs=[
                pl.BlockSpec((tm, K), lambda i, j: (i, 0)),         # x tile
                _block_spec((K, 2 * tn), lambda i, j: (0, j),       # fused W
                            resident and single_buffer),
                _block_spec((1, 2 * tn), lambda i, j: (0, j),       # fused bias
                            resident and single_buffer),
            ],
            out_specs=pl.BlockSpec((tm, tn), lambda i, j: (i, j)),
        ),
        compiler_params=pltpu.CompilerParams(
            dimension_semantics=("parallel", "arbitrary"),
            vmem_limit_bytes=int((vmem_bytes * 17) // 20),
        ),
        cost_estimate=cost,
    )(x2, w_fused, b_fused)

    if m_pad != M or npad != n_out:
        out = out[:M, :n_out]
    return out.reshape(orig_shape[:-1] + (n_out,))


_single_buffer_ok = True  # flipped off once if pl.Buffered(1) is rejected


def gated_tanh_prepared(x, w_fused, b_fused, meta):
    """Forward with pre-fused params (preferred: no per-call weight concat)."""
    global _single_buffer_ok
    kw = dict(n_out=meta.n_out, tn=meta.tn, num_n=meta.num_n)
    if _single_buffer_ok:
        try:
            return _gated_tanh_call(x, w_fused, b_fused, single_buffer=True, **kw)
        except Exception:
            _single_buffer_ok = False  # fall back to default double buffering
    return _gated_tanh_call(x, w_fused, b_fused, single_buffer=False, **kw)


def gated_tanh(x, w1, b1, w2, b2, *, compute_dtype=jnp.bfloat16):
    """Convenience API matching the original signature.

    For best performance call prepare_gated_tanh_params() once and reuse
    gated_tanh_prepared(); this path re-fuses the weights every call.
    """
    w_fused, b_fused, meta = prepare_gated_tanh_params(
        w1, b1, w2, b2, compute_dtype=compute_dtype)
    return gated_tanh_prepared(x, w_fused, b_fused, meta)


def init_gated_tanh_params(key, input_dims, output_dims, dtype=jnp.float32):
    """Deterministic init mimicking nn.Linear default (uniform +-1/sqrt(in))."""
    k1, k2, k3, k4 = jax.random.split(key, 4)
    bound = 1.0 / jnp.sqrt(jnp.float32(input_dims))
    # PyTorch weight shape is (out, in); store transposed (in, out) for the kernel.
    w1 = jax.random.uniform(k1, (input_dims, output_dims), dtype, -bound, bound)
    b1 = jax.random.uniform(k2, (output_dims,), dtype, -bound, bound)
    w2 = jax.random.uniform(k3, (input_dims, output_dims), dtype, -bound, bound)
    b2 = jax.random.uniform(k4, (output_dims,), dtype, -bound, bound)
    return w1, b1, w2, b2


if __name__ == "__main__":
    key = jax.random.PRNGKey(0)
    k_x, k_p = jax.random.split(key)

    batch = 8
    input_dims = 32
    output_dims = 32

    x = jax.random.normal(k_x, (batch, input_dims), jnp.float32)
    w1, b1, w2, b2 = init_gated_tanh_params(k_p, input_dims, output_dims)
    ref = jnp.tanh(x @ w1 + b1) * jax.nn.sigmoid(x @ w2 + b2)

    # Default bf16 MXU path; weights fused/cast once and reused across calls.
    wf, bf, meta = prepare_gated_tanh_params(w1, b1, w2, b2)
    out = jax.block_until_ready(gated_tanh_prepared(x, wf, bf, meta))
    assert out.shape == (batch, output_dims)
    assert jnp.allclose(out, ref, atol=3e-2, rtol=3e-2)

    # Exact f32 path.
    wf32, bf32, meta32 = prepare_gated_tanh_params(
        w1, b1, w2, b2, compute_dtype=jnp.float32)
    out32 = jax.block_until_ready(gated_tanh_prepared(x, wf32, bf32, meta32))
    assert jnp.allclose(out32, ref, atol=1e-5, rtol=1e-5)

    # Non-multiple-of-tile batch exercises the pad/slice path + convenience API.
    x_odd = jax.random.normal(k_x, (3, 5, input_dims), jnp.float32)
    out_odd = jax.block_until_ready(
        gated_tanh(x_odd, w1, b1, w2, b2, compute_dtype=jnp.float32))
    ref_odd = jnp.tanh(x_odd @ w1 + b1) * jax.nn.sigmoid(x_odd @ w2 + b2)
    assert out_odd.shape == (3, 5, output_dims)
    assert jnp.allclose(out_odd, ref_odd, atol=1e-5, rtol=1e-5)

    print("KERNEL_OK")
</pallas_src>

<mosaic_0001>
module attributes {stable_mosaic.version = 11 : i64} {
  func.func @gated_tanh_kernel(%arg0: i32, %arg1: i32, %arg2: memref<8x32xf32, #tpu.memory_space<vmem>>, %arg3: memref<32x256xbf16, #tpu.memory_space<vmem>>, %arg4: memref<1x256xf32, #tpu.memory_space<vmem>>, %arg5: memref<8x128xf32, #tpu.memory_space<vmem>>) attributes {dimension_semantics = [#tpu.dimension_semantics<parallel>, #tpu.dimension_semantics<arbitrary>], iteration_bounds = array<i64: 1, 1>, scalar_prefetch = 0 : i64, scratch_operands = 0 : i64, tpu.core_type = #tpu.core_type<tc>, window_params = [{transform_indices = @transform_0, window_bounds = array<i64: 8, 32>}, {pipeline_mode = #tpu.pipeline_mode<synchronous>, transform_indices = @transform_1, window_bounds = array<i64: 32, 256>}, {pipeline_mode = #tpu.pipeline_mode<synchronous>, transform_indices = @transform_2, window_bounds = array<i64: 1, 256>}, {transform_indices = @transform_3, window_bounds = array<i64: 8, 128>}]} {
    %c0 = arith.constant 0 : index
    %c0_0 = arith.constant 0 : index
    %0 = vector.load %arg2[%c0, %c0_0] : memref<8x32xf32, #tpu.memory_space<vmem>>, vector<8x32xf32>
    %1 = arith.truncf %0 : vector<8x32xf32> to vector<8x32xbf16>
    %c0_1 = arith.constant 0 : index
    %c0_2 = arith.constant 0 : index
    %2 = vector.load %arg3[%c0_1, %c0_2] : memref<32x256xbf16, #tpu.memory_space<vmem>>, vector<32x256xbf16>
    %cst = arith.constant dense<0.000000e+00> : vector<8x256xf32>
    %3 = tpu.matmul %1, %2, %cst {dimension_numbers = #tpu.dot_dimension_numbers<[1], [0], [0], [1], [0, 0, 1, 1], [], []>} : vector<8x32xbf16>, vector<32x256xbf16>, vector<8x256xf32> -> vector<8x256xf32>
    %c0_3 = arith.constant 0 : index
    %c0_4 = arith.constant 0 : index
    %4 = vector.load %arg4[%c0_3, %c0_4] : memref<1x256xf32, #tpu.memory_space<vmem>>, vector<1x256xf32>
    %5 = vector.broadcast %4 : vector<1x256xf32> to vector<8x256xf32>
    %6 = arith.addf %3, %5 : vector<8x256xf32>
    %7 = vector.extract_strided_slice %6 {offsets = [0, 0], sizes = [8, 128], strides = [1, 1]} : vector<8x256xf32> to vector<8x128xf32>
    %8 = math.tanh %7 : vector<8x128xf32>
    %9 = vector.extract_strided_slice %6 {offsets = [0, 128], sizes = [8, 128], strides = [1, 1]} : vector<8x256xf32> to vector<8x128xf32>
    %10 = arith.negf %9 : vector<8x128xf32>
    %11 = math.exp %10 : vector<8x128xf32>
    %cst_5 = arith.constant 1.000000e+00 : f32
    %12 = vector.broadcast %cst_5 : f32 to vector<8x128xf32>
    %13 = arith.addf %12, %11 : vector<8x128xf32>
    %14 = arith.divf %12, %13 : vector<8x128xf32>
    %15 = arith.mulf %8, %14 : vector<8x128xf32>
    %c0_6 = arith.constant 0 : index
    %c0_7 = arith.constant 0 : index
    %16 = vector.load %arg5[%c0_6, %c0_7] : memref<8x128xf32, #tpu.memory_space<vmem>>, vector<8x128xf32>
    tpu.vector_store %arg5[%c0_6, %c0_7], %15 {strides = array<i32>} : memref<8x128xf32, #tpu.memory_space<vmem>>, vector<8x128xf32>,
    return
  }
  func.func @transform_0(%arg0: i32, %arg1: i32) -> (i32, i32) {
    %c0_i32 = arith.constant 0 : i32
    %c0_i32_0 = arith.constant 0 : i32
    return %arg0, %c0_i32 : i32, i32
  }
  func.func @transform_1(%arg0: i32, %arg1: i32) -> (i32, i32) {
    %c0_i32 = arith.constant 0 : i32
    %c0_i32_0 = arith.constant 0 : i32
    return %c0_i32, %arg1 : i32, i32
  }
  func.func @transform_2(%arg0: i32, %arg1: i32) -> (i32, i32) {
    %c0_i32 = arith.constant 0 : i32
    %c0_i32_0 = arith.constant 0 : i32
    return %c0_i32, %arg1 : i32, i32
  }
  func.func @transform_3(%arg0: i32, %arg1: i32) -> (i32, i32) {
    %c0_i32 = arith.constant 0 : i32
    return %arg0, %arg1 : i32, i32
  }
}

module attributes {stable_mosaic.version = 11 : i64} {
  func.func @gated_tanh_kernel(%arg0: i32, %arg1: i32, %arg2: memref<8x32xf32, #tpu.memory_space<vmem>>, %arg3: memref<32x256xbf16, #tpu.memory_space<vmem>>, %arg4: memref<1x256xf32, #tpu.memory_space<vmem>>, %arg5: memref<8x128xf32, #tpu.memory_space<vmem>>) attributes {dimension_semantics = [#tpu.dimension_semantics<parallel>, #tpu.dimension_semantics<arbitrary>], iteration_bounds = array<i64: 1, 1>, scalar_prefetch = 0 : i64, scratch_operands = 0 : i64, tpu.core_type = #tpu.core_type<tc>, window_params = [{transform_indices = @transform_0, window_bounds = array<i64: 8, 32>}, {transform_indices = @transform_1, window_bounds = array<i64: 32, 256>}, {transform_indices = @transform_2, window_bounds = array<i64: 1, 256>}, {transform_indices = @transform_3, window_bounds = array<i64: 8, 128>}]} {
    %c0 = arith.constant 0 : index
    %c0_0 = arith.constant 0 : index
    %0 = vector.load %arg2[%c0, %c0_0] : memref<8x32xf32, #tpu.memory_space<vmem>>, vector<8x32xf32>
    %1 = arith.truncf %0 : vector<8x32xf32> to vector<8x32xbf16>
    %c0_1 = arith.constant 0 : index
    %c0_2 = arith.constant 0 : index
    %2 = vector.load %arg3[%c0_1, %c0_2] : memref<32x256xbf16, #tpu.memory_space<vmem>>, vector<32x256xbf16>
    %cst = arith.constant dense<0.000000e+00> : vector<8x256xf32>
    %3 = tpu.matmul %1, %2, %cst {dimension_numbers = #tpu.dot_dimension_numbers<[1], [0], [0], [1], [0, 0, 1, 1], [], []>} : vector<8x32xbf16>, vector<32x256xbf16>, vector<8x256xf32> -> vector<8x256xf32>
    %c0_3 = arith.constant 0 : index
    %c0_4 = arith.constant 0 : index
    %4 = vector.load %arg4[%c0_3, %c0_4] : memref<1x256xf32, #tpu.memory_space<vmem>>, vector<1x256xf32>
    %5 = vector.broadcast %4 : vector<1x256xf32> to vector<8x256xf32>
    %6 = arith.addf %3, %5 : vector<8x256xf32>
    %7 = vector.extract_strided_slice %6 {offsets = [0, 0], sizes = [8, 128], strides = [1, 1]} : vector<8x256xf32> to vector<8x128xf32>
    %8 = math.tanh %7 : vector<8x128xf32>
    %9 = vector.extract_strided_slice %6 {offsets = [0, 128], sizes = [8, 128], strides = [1, 1]} : vector<8x256xf32> to vector<8x128xf32>
    %10 = arith.negf %9 : vector<8x128xf32>
    %11 = math.exp %10 : vector<8x128xf32>
    %cst_5 = arith.constant 1.000000e+00 : f32
    %12 = vector.broadcast %cst_5 : f32 to vector<8x128xf32>
    %13 = arith.addf %12, %11 : vector<8x128xf32>
    %14 = arith.divf %12, %13 : vector<8x128xf32>
    %15 = arith.mulf %8, %14 : vector<8x128xf32>
    %c0_6 = arith.constant 0 : index
    %c0_7 = arith.constant 0 : index
    %16 = vector.load %arg5[%c0_6, %c0_7] : memref<8x128xf32, #tpu.memory_space<vmem>>, vector<8x128xf32>
    tpu.vector_store %arg5[%c0_6, %c0_7], %15 {strides = array<i32>} : memref<8x128xf32, #tpu.memory_space<vmem>>, vector<8x128xf32>,
    return
  }
  func.func @transform_0(%arg0: i32, %arg1: i32) -> (i32, i32) {
    %c0_i32 = arith.constant 0 : i32
    %c0_i32_0 = arith.constant 0 : i32
    return %arg0, %c0_i32 : i32, i32
  }
  func.func @transform_1(%arg0: i32, %arg1: i32) -> (i32, i32) {
    %c0_i32 = arith.constant 0 : i32
    %c0_i32_0 = arith.constant 0 : i32
    return %c0_i32, %arg1 : i32, i32
  }
  func.func @transform_2(%arg0: i32, %arg1: i32) -> (i32, i32) {
    %c0_i32 = arith.constant 0 : i32
    %c0_i32_0 = arith.constant 0 : i32
    return %c0_i32, %arg1 : i32, i32
  }
  func.func @transform_3(%arg0: i32, %arg1: i32) -> (i32, i32) {
    %c0_i32 = arith.constant 0 : i32
    return %arg0, %arg1 : i32, i32
  }
}

</mosaic_0001>

<bundles_post_ra>
// kernel: _gated_tanh_call.1
= control target key start
LH: loop header
LB: loop body
LE: loop exit
PB: predicated region body
PF: predicated region fallthrough
CT: control target
= control target key end

     0   :  { %8 = vsyncpa [#allocation3], 0  ;;  %s278_s0 = inlined_call_operand.hbm [shape: f32[8,32], index: 0, kind: input, shape index: {}]   ;;  %s279_s1 = inlined_call_operand.hbm [shape: bf16[32,256], index: 1, kind: input, shape index: {}]   ;;  %s280_s2 = inlined_call_operand.vmem [shape: f32[1,256], index: 2, kind: input, shape index: {}]   ;;  %s281_s3 = inlined_call_operand.hbm [shape: f32[8,128], index: 3, kind: output, shape index: {}]  }
   0x1   :  { %9 = vsyncpa [#allocation6], 0 }
   0x2   :  { %10 = vsyncpa [#allocation4], 0  ;;  %s240_s12 = smov [#allocation2]   ;;  %s241_s14 = smov [#allocation5]  }
   0x3   :  { %s17_s13 = sshll.u32 %s240_s12, 4  ;;  %s26_s15 = sshll.u32 %s241_s14, 4  ;;  %s18_s13 = int_to_ptr.vmem [resolvable:$true] %s17_s13  ;;  %s27_s15 = int_to_ptr.vmem [resolvable:$true] %s26_s15 }
   0x4   :  { %s182_s16 = scalar_lea.vmem %s18_s13, 128  ;;  %p187_p1 = scmp.lt.s32.totalorder %s18_s13, %s18_s13 }
   0x5   :  { %p183_p0 = scmp.ne.s32.totalorder %s18_s13, %s182_s16  ;;  %p188_p2 = scmp.lt.s32.totalorder %s182_s16, %s182_s16 }
   0x7   :  { %p189_p3 = por %p188_p2, %p187_p1 }
   0x9   :  { %p190_p4 = pnand %p189_p3, %p183_p0 }
   0xb   :  { %193 = shalt.err (!%p190_p4)
}
   0xc   :  { %20 = dma.hbm_to_vmem [thread:$0]  %s278_s0, 128, %s18_s13, [#allocation3]  }
   0xd   :  { %s202_s19 = scalar_lea.vmem %s27_s15, 512  ;;  %p207_p6 = scmp.lt.s32.totalorder %s27_s15, %s27_s15 }
   0xe   :  { %p203_p5 = scmp.ne.s32.totalorder %s27_s15, %s202_s19  ;;  %p208_p7 = scmp.lt.s32.totalorder %s202_s19, %s202_s19 }
  0x10   :  { %p209_p8 = por %p208_p7, %p207_p6 }
  0x12   :  { %p210_p9 = pnand %p209_p8, %p203_p5 }
  0x14   :  { %213 = shalt.err (!%p210_p9)
}
  0x15   :  { %s242_s20 = smov 128   ;;  %s243_s21 = smov 8  }
  0x16   :  { %32 = dma.hbm_to_vmem [thread:$0]  %s279_s1, 512, %s27_s15, [#allocation6], %s242_s20, %s242_s20, %s243_s21  }
  0x17   :  { %234 = dma.done.wait [#allocation3], 128  }
  0x18   :  { %235 = vsyncadd [#allocation3], 4294967168 }
  0x19   :  { %236 = dma.done.wait [#allocation6], 512  }
  0x1a   :  { %237 = vsyncadd [#allocation6], 4294966784  ;;  %v244_v0 = vmov 0   ;;  %v162_v1 = vld [vmem:[#allocation5 + $0x14] ss:$8 sps:$4 sm:$0xff]   ;;  %vm80_vm0 = vcmask 261120   ;;  %v50_v7 = vlaneseq }
  0x1b   :  { %116 = vmatprep.mubr.bf16.mxu0 %v244_v0  ;;  %v164_v2 = vld [vmem:[#allocation5 + $0x10] ss:$8 sps:$4 sm:$0xff]   ;;  %96 = vmatprep.subr.bf16.mxu0 %v162_v1  ;;  %v165_v3 = vld [vmem:[#allocation5 + $0x4] ss:$8 sps:$4 sm:$0xff]   ;;  %v167_v4 = vld [vmem:[#allocation5] ss:$8 sps:$4 sm:$0xff]  }
  0x1c   :  { %97 = vmatpush1.bf16.msra.mxu0 %v164_v2  ;;  %v42_v5 = vld [vmem:[#allocation2] sm:$0xff]  ;;  %v51_v8 = vshrl.u32 %v50_v7, 7  ;;  %s245_s24 = smov [#allocation7]  }
  0x1d   :  { %98 = vmatprep.subr.bf16.mxu0 %v165_v3  ;;  %v43_v6 = vpack.c.bf16 %v42_v5, %v42_v5  ;;  %v48_v10 = vld [vmem:[%s280_s2] sm:$0x3]  ;;  %s140_s25 = sshll.u32 %s245_s24, 4  ;;  %s141_s25 = int_to_ptr.vmem [resolvable:$true] %s140_s25 }
  0x1e   :  { %v56_v9 = vsub.s32 1, %v51_v8  ;;  %v52_v18 = vsub.s32 0, %v51_v8  ;;  %s214_s2 = scalar_lea.vmem %s141_s25, 128  ;;  %p219_p11 = scmp.lt.s32.totalorder %s141_s25, %s141_s25 }
  0x1f   :  { %p215_p10 = scmp.ne.s32.totalorder %s141_s25, %s214_s2  ;;  %p220_p12 = scmp.lt.s32.totalorder %s214_s2, %s214_s2 }
  0x20   :  { %99 = vmatpush1.bf16.msra.mxu0 %v167_v4  ;;  %v57_v11 = vrot.slane %v48_v10, %v56_v9  ;;  %v53_v19 = vrot.slane %v48_v10, %v52_v18 }
  0x21   :  { %p221_p13 = por %p220_p12, %p219_p11 }
  0x23   :  { %154 = vmatmul.mubr.msk.bf16.vlgmr.msra.gmra.mxu0 %vm80_vm0, %v43_v6  ;;  %p222_p0 = pnand %p221_p13, %p215_p10 }
  0xe3   :  { %v118_v12 = vpop.f32.mrf.mxu0 }
  0xe4   :  { %v119_v20 = vadd.f32 %v118_v12, %v53_v19 }
  0xe5   :  { %v120_v13 = vpop.f32.mrf.mxu0 }
  0xe6   :  { %v121_v14 = vadd.f32 %v120_v13, %v57_v11 }
  0xe7   :  { %v122_v15 = vpop.f32.mrf.mxu0 }
  0xe8   :  { %v155_v16 = vmul.f32 -1.442695, %v121_v14 }
  0xe9   :  { %v123_v17 = vpop.f32.mrf.mxu0 }
  0xea   :  { %168 = vpow2.f32 %v155_v16 }
  0xeb   :  { %170 = vtanh.f32 %v119_v20 }
  0xf7   :  { %v169_v21 = vpop.eup %168 }
  0xf8   :  { %v129_v22 = vadd.f32 1.0, %v169_v21  ;;  %v171_v23 = vpop.eup %170 }
  0xfa   :  { %172 = vrcp.f32 %v129_v22 }
 0x107   :  { %v173_v24 = vpop.eup %172 }
 0x108   :  { %v132_v25 = vmul.f32 %v173_v24, %v171_v23 }
 0x10a   :  { %133 = vst [vmem:[#allocation7] sm:$0xff] %v132_v25 }
 0x10b   :  { %225 = shalt.err (!%p222_p0)
}
 0x10c   :  { %143 = dma.vmem_to_hbm [thread:$0]  %s141_s25, 128, %s281_s3, [#allocation4]  }
 0x10d   :  { %238 = dma.done.wait [#allocation4], 128  }
 0x10e   :  { %239 = vsyncadd [#allocation4], 4294967168 }
 0x10f   :  { %147 = vsyncpa [#allocation3], 1 }
 0x110   :  { %148 = vsyncpa [#allocation6], 1 }
 0x111   :  { %149 = vsyncpa [#allocation4], 1 }

// kernel: _gated_tanh_call.1
= control target key start
LH: loop header
LB: loop body
LE: loop exit
PB: predicated region body
PF: predicated region fallthrough
CT: control target
= control target key end

     0   :  { %8 = vsyncpa [#allocation3], 0  ;;  %s278_s0 = inlined_call_operand.hbm [shape: f32[8,32], index: 0, kind: input, shape index: {}]   ;;  %s279_s1 = inlined_call_operand.hbm [shape: bf16[32,256], index: 1, kind: input, shape index: {}]   ;;  %s280_s2 = inlined_call_operand.vmem [shape: f32[1,256], index: 2, kind: input, shape index: {}]   ;;  %s281_s3 = inlined_call_operand.hbm [shape: f32[8,128], index: 3, kind: output, shape index: {}]  }
   0x1   :  { %9 = vsyncpa [#allocation6], 0 }
   0x2   :  { %10 = vsyncpa [#allocation4], 0  ;;  %s240_s12 = smov [#allocation2]   ;;  %s241_s14 = smov [#allocation5]  }
   0x3   :  { %s17_s13 = sshll.u32 %s240_s12, 4  ;;  %s26_s15 = sshll.u32 %s241_s14, 4  ;;  %s18_s13 = int_to_ptr.vmem [resolvable:$true] %s17_s13  ;;  %s27_s15 = int_to_ptr.vmem [resolvable:$true] %s26_s15 }
   0x4   :  { %s182_s16 = scalar_lea.vmem %s18_s13, 128  ;;  %p187_p1 = scmp.lt.s32.totalorder %s18_s13, %s18_s13 }
   0x5   :  { %p183_p0 = scmp.ne.s32.totalorder %s18_s13, %s182_s16  ;;  %p188_p2 = scmp.lt.s32.totalorder %s182_s16, %s182_s16 }
   0x7   :  { %p189_p3 = por %p188_p2, %p187_p1 }
   0x9   :  { %p190_p4 = pnand %p189_p3, %p183_p0 }
   0xb   :  { %193 = shalt.err (!%p190_p4)
}
   0xc   :  { %20 = dma.hbm_to_vmem [thread:$0]  %s278_s0, 128, %s18_s13, [#allocation3]  }
   0xd   :  { %s202_s19 = scalar_lea.vmem %s27_s15, 512  ;;  %p207_p6 = scmp.lt.s32.totalorder %s27_s15, %s27_s15 }
   0xe   :  { %p203_p5 = scmp.ne.s32.totalorder %s27_s15, %s202_s19  ;;  %p208_p7 = scmp.lt.s32.totalorder %s202_s19, %s202_s19 }
  0x10   :  { %p209_p8 = por %p208_p7, %p207_p6 }
  0x12   :  { %p210_p9 = pnand %p209_p8, %p203_p5 }
  0x14   :  { %213 = shalt.err (!%p210_p9)
}
  0x15   :  { %s242_s20 = smov 128   ;;  %s243_s21 = smov 8  }
  0x16   :  { %32 = dma.hbm_to_vmem [thread:$0]  %s279_s1, 512, %s27_s15, [#allocation6], %s242_s20, %s242_s20, %s243_s21  }
  0x17   :  { %234 = dma.done.wait [#allocation3], 128  }
  0x18   :  { %235 = vsyncadd [#allocation3], 4294967168 }
  0x19   :  { %236 = dma.done.wait [#allocation6], 512  }
  0x1a   :  { %237 = vsyncadd [#allocation6], 4294966784  ;;  %v244_v0 = vmov 0   ;;  %v162_v1 = vld [vmem:[#allocation5 + $0x14] ss:$8 sps:$4 sm:$0xff]   ;;  %vm80_vm0 = vcmask 261120   ;;  %v50_v7 = vlaneseq }
  0x1b   :  { %116 = vmatprep.mubr.bf16.mxu0 %v244_v0  ;;  %v164_v2 = vld [vmem:[#allocation5 + $0x10] ss:$8 sps:$4 sm:$0xff]   ;;  %96 = vmatprep.subr.bf16.mxu0 %v162_v1  ;;  %v165_v3 = vld [vmem:[#allocation5 + $0x4] ss:$8 sps:$4 sm:$0xff]   ;;  %v167_v4 = vld [vmem:[#allocation5] ss:$8 sps:$4 sm:$0xff]  }
  0x1c   :  { %97 = vmatpush1.bf16.msra.mxu0 %v164_v2  ;;  %v42_v5 = vld [vmem:[#allocation2] sm:$0xff]  ;;  %v51_v8 = vshrl.u32 %v50_v7, 7  ;;  %s245_s24 = smov [#allocation7]  }
  0x1d   :  { %98 = vmatprep.subr.bf16.mxu0 %v165_v3  ;;  %v43_v6 = vpack.c.bf16 %v42_v5, %v42_v5  ;;  %v48_v10 = vld [vmem:[%s280_s2] sm:$0x3]  ;;  %s140_s25 = sshll.u32 %s245_s24, 4  ;;  %s141_s25 = int_to_ptr.vmem [resolvable:$true] %s140_s25 }
  0x1e   :  { %v56_v9 = vsub.s32 1, %v51_v8  ;;  %v52_v18 = vsub.s32 0, %v51_v8  ;;  %s214_s2 = scalar_lea.vmem %s141_s25, 128  ;;  %p219_p11 = scmp.lt.s32.totalorder %s141_s25, %s141_s25 }
  0x1f   :  { %p215_p10 = scmp.ne.s32.totalorder %s141_s25, %s214_s2  ;;  %p220_p12 = scmp.lt.s32.totalorder %s214_s2, %s214_s2 }
  0x20   :  { %99 = vmatpush1.bf16.msra.mxu0 %v167_v4  ;;  %v57_v11 = vrot.slane %v48_v10, %v56_v9  ;;  %v53_v19 = vrot.slane %v48_v10, %v52_v18 }
  0x21   :  { %p221_p13 = por %p220_p12, %p219_p11 }
  0x23   :  { %154 = vmatmul.mubr.msk.bf16.vlgmr.msra.gmra.mxu0 %vm80_vm0, %v43_v6  ;;  %p222_p0 = pnand %p221_p13, %p215_p10 }
  0xe3   :  { %v118_v12 = vpop.f32.mrf.mxu0 }
  0xe4   :  { %v119_v20 = vadd.f32 %v118_v12, %v53_v19 }
  0xe5   :  { %v120_v13 = vpop.f32.mrf.mxu0 }
  0xe6   :  { %v121_v14 = vadd.f32 %v120_v13, %v57_v11 }
  0xe7   :  { %v122_v15 = vpop.f32.mrf.mxu0 }
  0xe8   :  { %v155_v16 = vmul.f32 -1.442695, %v121_v14 }
  0xe9   :  { %v123_v17 = vpop.f32.mrf.mxu0 }
  0xea   :  { %168 = vpow2.f32 %v155_v16 }
  0xeb   :  { %170 = vtanh.f32 %v119_v20 }
  0xf7   :  { %v169_v21 = vpop.eup %168 }
  0xf8   :  { %v129_v22 = vadd.f32 1.0, %v169_v21  ;;  %v171_v23 = vpop.eup %170 }
  0xfa   :  { %172 = vrcp.f32 %v129_v22 }
 0x107   :  { %v173_v24 = vpop.eup %172 }
 0x108   :  { %v132_v25 = vmul.f32 %v173_v24, %v171_v23 }
 0x10a   :  { %133 = vst [vmem:[#allocation7] sm:$0xff] %v132_v25 }
 0x10b   :  { %225 = shalt.err (!%p222_p0)
}
 0x10c   :  { %143 = dma.vmem_to_hbm [thread:$0]  %s141_s25, 128, %s281_s3, [#allocation4]  }
 0x10d   :  { %238 = dma.done.wait [#allocation4], 128  }
 0x10e   :  { %239 = vsyncadd [#allocation4], 4294967168 }
 0x10f   :  { %147 = vsyncpa [#allocation3], 1 }
 0x110   :  { %148 = vsyncpa [#allocation6], 1 }
 0x111   :  { %149 = vsyncpa [#allocation4], 1 }

</bundles_post_ra>
